<compile_context>
chip_gen: v7x
topology: tpu7x:2x2x1
jax: 0.10.0
libtpu: 0.0.40
codegen_flags: <defaults>
</compile_context>

<pallas_src>
from functools import partial

import jax
import jax.numpy as jnp
from jax.experimental import pallas as pl
from jax.experimental.pallas import tpu as pltpu

NUM_CLASSES = 3
EPS = 0.001
LANES = 128
MAX_S_TILE = 1024   # sublanes per spatial tile (1024*128 px -> 1.5 MiB f32/class-slab tile)


def _iou_kernel(pred_ref, gt_ref, iou_ref, inter_acc, spred_acc, *,
                softmax, hw, s_tile, padded):
    """grid = (batch ["parallel"], spatial-tile ["arbitrary" reduction]).

    pred_ref: (1, C, S, 128) f32   gt_ref: (1, S, 128) i8   iou_ref: (1, 1, 128) f32
    """
    t = pl.program_id(1)

    @pl.when(t == 0)
    def _():
        inter_acc[...] = jnp.zeros_like(inter_acc)
        if not softmax:
            spred_acc[...] = jnp.zeros_like(spred_acc)

    x = pred_ref[...].astype(jnp.float32)            # (1, C, S, 128)
    g = gt_ref[...].astype(jnp.int32)                # (1, S, 128)
    x0, x1, x2 = x[:, 0], x[:, 1], x[:, 2]

    if softmax:
        # Only the gt-class probability is needed for the intersection.
        m = jnp.maximum(jnp.maximum(x0, x1), x2)     # elementwise (VPU), stable
        e0 = jnp.exp(x0 - m)
        e1 = jnp.exp(x1 - m)
        e2 = jnp.exp(x2 - m)
        e_sel = jnp.where(g == 0, e0, jnp.where(g == 1, e1, e2))
        p_sel = e_sel / (e0 + e1 + e2)
    else:
        p_sel = jnp.where(g == 0, x0, jnp.where(g == 1, x1, x2))

    if padded:
        # Mask pixels that exist only because of padding to a whole tile.
        s_idx = jax.lax.broadcasted_iota(jnp.int32, p_sel.shape, 1)
        l_idx = jax.lax.broadcasted_iota(jnp.int32, p_sel.shape, 2)
        pix = (t * s_tile + s_idx) * LANES + l_idx
        p_sel = jnp.where(pix < hw, p_sel, 0.0)

    inter_acc[...] = inter_acc[...] + jnp.sum(p_sel)          # single reduction
    if not softmax:
        # Padded pred entries are zero, so no mask is needed for this sum.
        spred_acc[...] = spred_acc[...] + jnp.sum(x)

    @pl.when(t == pl.num_programs(1) - 1)
    def _():
        inter = inter_acc[...]                                 # (1, 1)
        if softmax:
            union = 2.0 * hw - inter       # sum(softmax probs) == 1 per pixel
        else:
            union = hw + spred_acc[...] - inter
        iou = (inter + EPS) / (union + EPS)
        # Lane-dense write of the per-batch IoU (wrapper reads lane 0).
        iou_ref[...] = jnp.broadcast_to(iou.reshape(1, 1, 1), iou_ref.shape)


def iou_loss(pred, gt, softmax=False):
    """Pallas equivalent of IoULoss(softmax=softmax)(pred, gt).

    pred: (B, 3, H, W) float logits/probs; gt: (B, 1, H, W) integer labels in {0,1,2}.
    """
    B, C, H, W = pred.shape
    assert C == NUM_CLASSES, "IoUMetric hard-codes 3 classes"
    HW = H * W

    s_needed = pl.cdiv(HW, LANES)
    if s_needed <= MAX_S_TILE:
        s_tile, n_tiles = s_needed, 1
    else:
        s_tile = MAX_S_TILE
        n_tiles = pl.cdiv(s_needed, s_tile)
    s_pad = s_tile * n_tiles
    hw_pad = s_pad * LANES
    padded = hw_pad != HW

    pred_flat = pred.reshape(B, C, HW).astype(jnp.float32)
    gt_flat = gt.reshape(B, HW).astype(jnp.int8)      # labels 0..2 -> 1 byte/pixel
    if padded:
        pred_flat = jnp.pad(pred_flat, ((0, 0), (0, 0), (0, hw_pad - HW)))
        gt_flat = jnp.pad(gt_flat, ((0, 0), (0, hw_pad - HW)))
    pred4 = pred_flat.reshape(B, C, s_pad, LANES)     # sublane-dense spatial axis
    gt3 = gt_flat.reshape(B, s_pad, LANES)

    iou = pl.pallas_call(
        partial(_iou_kernel, softmax=softmax, hw=HW, s_tile=s_tile,
                padded=padded),
        out_shape=jax.ShapeDtypeStruct((B, 1, LANES), jnp.float32),
        grid_spec=pltpu.PrefetchScalarGridSpec(
            num_scalar_prefetch=0,
            grid=(B, n_tiles),
            in_specs=[
                pl.BlockSpec((1, C, s_tile, LANES), lambda b, t: (b, 0, t, 0)),
                pl.BlockSpec((1, s_tile, LANES), lambda b, t: (b, t, 0)),
            ],
            out_specs=pl.BlockSpec((1, 1, LANES), lambda b, t: (b, 0, 0)),
            scratch_shapes=[pltpu.VMEM((1, 1), jnp.float32),   # inter accumulator
                            pltpu.VMEM((1, 1), jnp.float32)],  # sum(pred) accumulator
        ),
        compiler_params=pltpu.CompilerParams(
            dimension_semantics=("parallel", "arbitrary")),
    )(pred4, gt3)

    per_batch_iou = iou[:, 0, 0]                      # (B,)
    return -jnp.log(jnp.mean(per_batch_iou))          # tiny finalize over B scalars


def iou_loss_ref(pred, gt, softmax=False):
    """Pure-JAX reference matching the PyTorch code."""
    pred = pred.astype(jnp.float32)
    if softmax:
        pred = jax.nn.softmax(pred, axis=1)
    onehot = jnp.concatenate([(gt == i) for i in range(NUM_CLASSES)],
                             axis=1).astype(jnp.float32)
    inter = onehot * pred
    union = onehot + pred - inter
    iou = (inter.sum(axis=(1, 2, 3)) + EPS) / (union.sum(axis=(1, 2, 3)) + EPS)
    return -jnp.log(iou.mean())


if __name__ == "__main__":
    key = jax.random.PRNGKey(0)
    k_pred, k_gt = jax.random.split(key)

    B, C, H, W = 2, 3, 16, 16
    pred = jax.random.normal(k_pred, (B, C, H, W), dtype=jnp.float32)   # raw logits
    gt = jax.random.randint(k_gt, (B, 1, H, W), 0, NUM_CLASSES, dtype=jnp.int32)

    # Path 1: IoULoss(softmax=True) on raw logits.
    loss_sm = jax.block_until_ready(iou_loss(pred, gt, softmax=True))
    ref_sm = jax.block_until_ready(iou_loss_ref(pred, gt, softmax=True))
    assert jnp.isfinite(loss_sm), f"non-finite loss: {loss_sm}"
    assert abs(float(loss_sm) - float(ref_sm)) < 1e-4, (float(loss_sm), float(ref_sm))

    # Path 2: IoULoss(softmax=False) on already-normalized probabilities.
    probs = jax.nn.softmax(pred, axis=1)
    loss_ns = jax.block_until_ready(iou_loss(probs, gt, softmax=False))
    ref_ns = jax.block_until_ready(iou_loss_ref(probs, gt, softmax=False))
    assert jnp.isfinite(loss_ns), f"non-finite loss: {loss_ns}"
    assert abs(float(loss_ns) - float(ref_ns)) < 1e-4, (float(loss_ns), float(ref_ns))

    print("KERNEL_OK")
</pallas_src>

<mosaic_0001>
module attributes {stable_mosaic.version = 11 : i64} {
  func.func @_iou_kernel(%arg0: i32, %arg1: i32, %arg2: memref<1x3x2x128xf32, #tpu.memory_space<vmem>>, %arg3: memref<1x2x128xi8, #tpu.memory_space<vmem>>, %arg4: memref<1x1x128xf32, #tpu.memory_space<vmem>>, %arg5: memref<1x1xf32, #tpu.memory_space<vmem>>, %arg6: memref<1x1xf32, #tpu.memory_space<vmem>>) attributes {dimension_semantics = [#tpu.dimension_semantics<parallel>, #tpu.dimension_semantics<arbitrary>], iteration_bounds = array<i64: 2, 1>, scalar_prefetch = 0 : i64, scratch_operands = 2 : i64, tpu.core_type = #tpu.core_type<tc>, window_params = [{transform_indices = @transform_0, window_bounds = array<i64: 1, 3, 2, 128>}, {transform_indices = @transform_1, window_bounds = array<i64: 1, 2, 128>}, {transform_indices = @transform_2, window_bounds = array<i64: 1, 1, 128>}]} {
    %c0_i32 = arith.constant 0 : i32
    %0 = arith.cmpi eq, %arg1, %c0_i32 : i32
    %1 = arith.extui %0 : i1 to i32
    %c0_i32_0 = arith.constant 0 : i32
    %2 = arith.cmpi ne, %1, %c0_i32_0 : i32
    scf.if %2 {
      %cst_14 = arith.constant 0.000000e+00 : f32
      %40 = vector.broadcast %cst_14 : f32 to vector<1x1xf32>
      %c0_15 = arith.constant 0 : index
      %c0_16 = arith.constant 0 : index
      %41 = vector.load %arg5[%c0_15, %c0_16] : memref<1x1xf32, #tpu.memory_space<vmem>>, vector<1x1xf32>
      tpu.vector_store %arg5[%c0_15, %c0_16], %40 {strides = array<i32>} : memref<1x1xf32, #tpu.memory_space<vmem>>, vector<1x1xf32>,
    } else {
    }
    %c0 = arith.constant 0 : index
    %c0_1 = arith.constant 0 : index
    %c0_2 = arith.constant 0 : index
    %c0_3 = arith.constant 0 : index
    %3 = vector.load %arg2[%c0, %c0_1, %c0_2, %c0_3] : memref<1x3x2x128xf32, #tpu.memory_space<vmem>>, vector<1x3x2x128xf32>
    %c0_4 = arith.constant 0 : index
    %c0_5 = arith.constant 0 : index
    %c0_6 = arith.constant 0 : index
    %4 = vector.load %arg3[%c0_4, %c0_5, %c0_6] : memref<1x2x128xi8, #tpu.memory_space<vmem>>, vector<1x2x128xi8>
    %5 = arith.extsi %4 : vector<1x2x128xi8> to vector<1x2x128xi32>
    %6 = vector.extract_strided_slice %3 {offsets = [0, 0, 0, 0], sizes = [1, 1, 2, 128], strides = [1, 1, 1, 1]} : vector<1x3x2x128xf32> to vector<1x1x2x128xf32>
    %7 = vector.shape_cast %6 : vector<1x1x2x128xf32> to vector<1x2x128xf32>
    %8 = vector.extract_strided_slice %3 {offsets = [0, 1, 0, 0], sizes = [1, 1, 2, 128], strides = [1, 1, 1, 1]} : vector<1x3x2x128xf32> to vector<1x1x2x128xf32>
    %9 = vector.shape_cast %8 : vector<1x1x2x128xf32> to vector<1x2x128xf32>
    %10 = vector.extract_strided_slice %3 {offsets = [0, 2, 0, 0], sizes = [1, 1, 2, 128], strides = [1, 1, 1, 1]} : vector<1x3x2x128xf32> to vector<1x1x2x128xf32>
    %11 = vector.shape_cast %10 : vector<1x1x2x128xf32> to vector<1x2x128xf32>
    %12 = arith.maximumf %7, %9 : vector<1x2x128xf32>
    %13 = arith.maximumf %12, %11 : vector<1x2x128xf32>
    %14 = arith.subf %7, %13 : vector<1x2x128xf32>
    %15 = math.exp %14 : vector<1x2x128xf32>
    %16 = arith.subf %9, %13 : vector<1x2x128xf32>
    %17 = math.exp %16 : vector<1x2x128xf32>
    %18 = arith.subf %11, %13 : vector<1x2x128xf32>
    %19 = math.exp %18 : vector<1x2x128xf32>
    %c0_i32_7 = arith.constant 0 : i32
    %20 = vector.broadcast %c0_i32_7 : i32 to vector<1x2x128xi32>
    %21 = arith.cmpi eq, %5, %20 : vector<1x2x128xi32>
    %c1_i32 = arith.constant 1 : i32
    %22 = vector.broadcast %c1_i32 : i32 to vector<1x2x128xi32>
    %23 = arith.cmpi eq, %5, %22 : vector<1x2x128xi32>
    %24 = arith.select %23, %17, %19 : vector<1x2x128xi1>, vector<1x2x128xf32>
    %25 = arith.select %21, %15, %24 : vector<1x2x128xi1>, vector<1x2x128xf32>
    %26 = arith.addf %15, %17 : vector<1x2x128xf32>
    %27 = arith.addf %26, %19 : vector<1x2x128xf32>
    %28 = arith.divf %25, %27 : vector<1x2x128xf32>
    %c0_8 = arith.constant 0 : index
    %c0_9 = arith.constant 0 : index
    %29 = vector.load %arg5[%c0_8, %c0_9] : memref<1x1xf32, #tpu.memory_space<vmem>>, vector<1x1xf32>
    %30 = vector.shape_cast %28 : vector<1x2x128xf32> to vector<1x1x2x128xf32>
    %cst = arith.constant dense<0.000000e+00> : vector<1xf32>
    %31 = vector.multi_reduction <add>, %30, %cst [1, 2, 3] : vector<1x1x2x128xf32> to vector<1xf32>
    %32 = vector.shape_cast %31 : vector<1xf32> to vector<1x1x1x1xf32>
    %33 = vector.extract %32[0, 0, 0, 0] : f32 from vector<1x1x1x1xf32>
    %34 = vector.broadcast %33 : f32 to vector<1x1xf32>
    %35 = arith.addf %29, %34 : vector<1x1xf32>
    %c0_10 = arith.constant 0 : index
    %c0_11 = arith.constant 0 : index
    %36 = vector.load %arg5[%c0_10, %c0_11] : memref<1x1xf32, #tpu.memory_space<vmem>>, vector<1x1xf32>
    tpu.vector_store %arg5[%c0_10, %c0_11], %35 {strides = array<i32>} : memref<1x1xf32, #tpu.memory_space<vmem>>, vector<1x1xf32>,
    %c0_i32_12 = arith.constant 0 : i32
    %37 = arith.cmpi eq, %arg1, %c0_i32_12 : i32
    %38 = arith.extui %37 : i1 to i32
    %c0_i32_13 = arith.constant 0 : i32
    %39 = arith.cmpi ne, %38, %c0_i32_13 : i32
    scf.if %39 {
      %c0_14 = arith.constant 0 : index
      %c0_15 = arith.constant 0 : index
      %40 = vector.load %arg5[%c0_14, %c0_15] : memref<1x1xf32, #tpu.memory_space<vmem>>, vector<1x1xf32>
      %cst_16 = arith.constant 5.120000e+02 : f32
      %41 = vector.broadcast %cst_16 : f32 to vector<1x1xf32>
      %42 = arith.subf %41, %40 : vector<1x1xf32>
      %cst_17 = arith.constant 1.000000e-03 : f32
      %43 = vector.broadcast %cst_17 : f32 to vector<1x1xf32>
      %44 = arith.addf %40, %43 : vector<1x1xf32>
      %cst_18 = arith.constant 1.000000e-03 : f32
      %45 = vector.broadcast %cst_18 : f32 to vector<1x1xf32>
      %46 = arith.addf %42, %45 : vector<1x1xf32>
      %47 = arith.divf %44, %46 : vector<1x1xf32>
      %48 = vector.shape_cast %47 : vector<1x1xf32> to vector<1x1x1xf32>
      %49 = vector.shape_cast %48 : vector<1x1x1xf32> to vector<1x1x1xf32>
      %50 = vector.broadcast %49 : vector<1x1x1xf32> to vector<1x1x128xf32>
      %c0_19 = arith.constant 0 : index
      %c0_20 = arith.constant 0 : index
      %c0_21 = arith.constant 0 : index
      %51 = vector.load %arg4[%c0_19, %c0_20, %c0_21] : memref<1x1x128xf32, #tpu.memory_space<vmem>>, vector<1x1x128xf32>
      tpu.vector_store %arg4[%c0_19, %c0_20, %c0_21], %50 {strides = array<i32>} : memref<1x1x128xf32, #tpu.memory_space<vmem>>, vector<1x1x128xf32>,
    } else {
    }
    return
  }
  func.func @transform_0(%arg0: i32, %arg1: i32) -> (i32, i32, i32, i32) {
    %c0_i32 = arith.constant 0 : i32
    %c0_i32_0 = arith.constant 0 : i32
    %c0_i32_1 = arith.constant 0 : i32
    return %arg0, %c0_i32, %arg1, %c0_i32_0 : i32, i32, i32, i32
  }
  func.func @transform_1(%arg0: i32, %arg1: i32) -> (i32, i32, i32) {
    %c0_i32 = arith.constant 0 : i32
    %c0_i32_0 = arith.constant 0 : i32
    return %arg0, %arg1, %c0_i32 : i32, i32, i32
  }
  func.func @transform_2(%arg0: i32, %arg1: i32) -> (i32, i32, i32) {
    %c0_i32 = arith.constant 0 : i32
    %c0_i32_0 = arith.constant 0 : i32
    %c0_i32_1 = arith.constant 0 : i32
    return %arg0, %c0_i32, %c0_i32_0 : i32, i32, i32
  }
}

</mosaic_0001>

<bundles_post_ra>
// kernel: tpu_custom_call.1
= control target key start
LH: loop header
LB: loop body
LE: loop exit
PB: predicated region body
PF: predicated region fallthrough
CT: control target
= control target key end

     0   :  { %7 = vsyncpa [#allocation5], 0  ;;  %s774_s0 = inlined_call_operand.hbm [shape: f32[2,3,2,128], index: 0, kind: input, shape index: {}]   ;;  %s775_s1 = inlined_call_operand.vmem [shape: s8[2,2,128], index: 1, kind: input, shape index: {}]   ;;  %s776_s2 = inlined_call_operand.hbm [shape: f32[2,1,128], index: 2, kind: output, shape index: {}]  }
   0x1   :  { %9 = vsyncpa [#allocation5 + $0x1], 0 }
   0x2   :  { %10 = vsyncpa [#allocation6], 0 }
   0x3   :  { %12 = vsyncpa [#allocation6 + $0x1], 0  ;;  %s593_s9 = smov 0   ;;  %s595_s10 = smov 0  }
   0x4   :  { %s597_s11 = smov 0   ;;  %s599_s12 = smov 0  }
   0x5   :  { %s601_s13 = smov 0   ;;  %s603_s14 = smov 0  }
   0x6 LB: > { %s367_s15 = sadd.s32 4294967295, %s570_s14   ;;  %s368_s16 = sadd.s32 4294967294, %s570_s14   ;;  %s570_s14 = sphi %s603_s14, %s18_s14   ;;  %s566_s13 = sphi %s601_s13, %s791_s13   ;;  %s562_s12 = sphi %s599_s12, %s790_s12   ;;  %s558_s11 = sphi %s597_s11, %s789_s11   ;;  %s554_s10 = sphi %s595_s10, %s788_s10   ;;  %s550_s9 = sphi %s593_s9, %s787_s9  }
   0x7   : > { %s30_s17 = sadd.s32 1, %s566_s13  ;;  %s39_s18 = sadd.s32 1, %s558_s11 }
   0x8   : > { %p32_p0 = scmp.ge.s32.totalorder %s30_s17, 2  ;;  %p46_p1 = scmp.ne.s32.totalorder %s558_s11, %s554_s10 }
   0x9   : > { %p47_p2 = scmp.eq.s32.totalorder %s570_s14, 0  ;;  %p52_p3 = scmp.ne.s32.totalorder %s554_s10, %s550_s9 }
   0xa   : > { %s793_s17 = smov (%p32_p0, %s30_s17), 0  ;;  %p53_p5 = scmp.eq.s32.totalorder %s367_s15, 0 }
   0xb   : > { %p634_p4 = por %p47_p2, %p46_p1  ;;  %s34_s20 = ssub.s32 %s566_s13, %s793_s17 }
   0xc   : > { %p104_p6 = scmp.eq.s32.totalorder %s367_s15, 1  ;;  %p37_p7 = scmp.eq.s32.totalorder %s34_s20, 0 }
   0xd   : > { %p640_p8 = por %p53_p5, %p52_p3  ;;  %p110_p10 = scmp.eq.s32.totalorder %s368_s16, 1 }
   0xe   : > { %p644_p9 = por %p104_p6, %p46_p1  ;;  %p393_p13 = scmp.lt.s32.totalorder %s570_s14, 2 }
   0xf   : > { %s649_s23 = scalar_select %p37_p7, %s558_s11, %s39_s18  }
  0x10   : > { %s780_s22 = scalar_select %p644_p9, 1, 0 }
  0x11   : > { %p651_p11 = por %p110_p10, %p52_p3  ;;  %s130_s25 = sand.u32 1, %s558_s11  }
  0x12   : > { %s376_s26 = smul.u32 6, %s130_s25  ;;  %p661_p0 = pnand %p393_p13, %p634_p4 }
  0x13   : > { %s781_s24 = scalar_select %p651_p11, 1, 0 }
  0x14   : > { %s377_s27 = smul.u32 96, %s566_s13  ;;  %s134_s4 = scalar_lea.vmem [#allocation4], %s376_s26 }
  0x15   : > { %s142_s5 = sshll.u32 %s134_s4, 4  ;;  %s673_s6 = scalar_lea.sflag [#allocation5], %s130_s25  ;;  %s670_s5 = int_to_ptr.vmem [resolvable:$true] %s142_s5 }
  0x16   : > { %s668_s3 = scalar_lea.hbm %s774_s0, %s377_s27  ;;  %p460_p3 = pneg %p661_p0 }
  0x17   : > { %s458_s7 = scalar_lea.hbm %s668_s3, 96  ;;  %s463_s16 = scalar_lea.hbm %s774_s0, 192 }
  0x18   : > { %p459_p2 = scmp.ne.s32.totalorder %s668_s3, %s458_s7  ;;  %p464_p6 = scmp.lt.u32.totalorder %s668_s3, %s774_s0 }
  0x19   : > { %p465_p7 = scmp.lt.u32.totalorder %s463_s16, %s458_s7  ;;  %p467_p13 = scmp.lt.u32.totalorder %s458_s7, %s668_s3 }
  0x1a   : > { %p461_p4 = pnand %p460_p3, %p459_p2 }
  0x1b   : > { %p466_p10 = por %p465_p7, %p464_p6 }
  0x1c   : > { %p462_p5 = pneg %p461_p4 }
  0x1d   : > { %p468_p12 = por %p467_p13, %p466_p10 }
  0x1f   : > { %p469_p1 = pnand %p468_p12, %p462_p5 }
  0x21   : > { %472 = shalt.err (!%p469_p1)
}
  0x22   : > { %s473_s20 = scalar_lea.vmem %s670_s5, 96  ;;  %s572_s25 = smov [#allocation4]  }
  0x23   : > { %p474_p2 = scmp.ne.s32.totalorder %s670_s5, %s473_s20  ;;  %s478_s26 = sshll.u32 %s572_s25, 4  ;;  %s479_s26 = int_to_ptr.vmem [resolvable:$false] %s478_s26 }
  0x24   : > { %s480_s27 = scalar_lea.vmem %s479_s26, 192  ;;  %p481_p9 = scmp.lt.s32.totalorder %s670_s5, %s479_s26 }
  0x25   : > { %p476_p4 = pnand %p474_p2, %p460_p3  ;;  %p482_p6 = scmp.lt.s32.totalorder %s480_s27, %s473_s20 }
  0x27   : > { %p477_p11 = pneg %p476_p4  ;;  %p483_p7 = por %p482_p6, %p481_p9 }
  0x29   : > { %p484_p10 = pnand %p483_p7, %p477_p11 }
  0x2b   : > { %487 = shalt.err (!%p484_p10)
}
  0x2c   : > { %s573_s29 = smov 32   ;;  %s574_s30 = smov 2  }
  0x2d   : > { %388 = dma.hbm_to_vmem [thread:$0]  (!%p661_p0), %s668_s3, 96, %s670_s5, %s673_s6, %s573_s29, %s573_s29, %s574_s30  }
  0x2e   : > { %p159_p12 = scmp.lt.s32.totalorder %s570_s14, 3  ;;  %p783_p1 = scmp.ge.s32.totalorder %s570_s14, 1 }
  0x30   : > { %p160_p3 = pnand %p783_p1, %p159_p12 }
  0x31   : > { %s705_s4 = sand.u32 (!%p160_p3), 1, %s554_s10  }
  0x32   : > { %163 = sbr.rel (%p160_p3) target bundleno = 473 (0x1d9), region = 28  ;;  %s166_s8 = scalar_lea.sflag (!%p160_p3), [#allocation5], %s705_s4 }
  0x33   : > { %s378_s7 = smul.u32 (!%p160_p3), 6, %s705_s4 }
  0x35   : > { %s169_s15 = scalar_lea.vmem (!%p160_p3), [#allocation4], %s378_s7 }
  0x39   : > { %541 = dma.done.wait (%p640_p8), %s166_s8, 96  }
  0x3a   : > { %543 = vsyncadd (%p640_p8), %s166_s8, 4294967200  ;;  %v207_v0 = vld [vmem:[%s169_s15] sm:$0x3]  ;;  %v208_v1 = vld [vmem:[%s169_s15 + $0x2] sm:$0x3]  ;;  %p195_p9 = scmp.lt.s32.totalorder %s562_s12, 1  ;;  %v261_v41 = vlaneseq }
  0x3b   : > { %v209_v2 = vld [vmem:[%s169_s15 + $0x4] sm:$0x3]  ;;  %v212_v3 = vmax.f32 %v207_v0, %v208_v1  ;;  %vm232_vm2 = vcmask 1041408   ;;  %vm205_vm3 = vcmask 0   ;;  %v575_v23 = vmov 0.0   ;;  %s373_s16 = sshll.u32 %s562_s12, 4 }
  0x3c   : > { %s196_s28 = scalar_select %p195_p9, %s562_s12, 1  ;;  %206 = vst.msk [vmem:[#allocation2] sm:$0x1] %vm205_vm3, %v575_v23  ;;  %v576_v24 = vmov 0   ;;  %v262_v42 = vshrl.u32 %v261_v41, 7 }
  0x3d   : > { %v213_v4 = vmax.f32 %v212_v3, %v209_v2  ;;  %447 = vset.pattern.permute.xlu0 %v576_v24  ;;  %s194_s18 = scalar_lea.vmem [#allocation7], %s705_s4  ;;  %s725_s26 = scalar_lea.hbm %s776_s2, %s373_s16 }
  0x3e   : > { %s200_s5 = scalar_lea.vmem %s775_s1, %s196_s28  ;;  %v263_v43 = vsub.s32 0, %v262_v42  ;;  %s279_s19 = sshll.u32 %s194_s18, 4  ;;  %s727_s19 = int_to_ptr.vmem [resolvable:$true] %s279_s19 }
  0x3f   : > { %v214_v5 = vsub.f32 %v207_v0, %v213_v4  ;;  %v217_v6 = vsub.f32 %v208_v1, %v213_v4  ;;  %v220_v7 = vsub.f32 %v209_v2, %v213_v4  ;;  %v210_v13 = vld [vmem:[%s200_s5] sm:$0x1]  ;;  %s267_s27 = scalar_lea.sflag [#allocation6], %s705_s4  ;;  %s488_s29 = scalar_lea.vmem %s727_s19, 16 }
  0x40   : > { %v211_v16 = vunpack.c.0.s8 %v210_v13  ;;  %p489_p8 = scmp.ne.s32.totalorder %s727_s19, %s488_s29  ;;  %p784_p11 = scmp.ne.s32.totalorder %s780_s22, 0 }
  0x41   : > { %v215_v8 = vmul.f32 1.442695, %v214_v5  ;;  %v218_v9 = vmul.f32 1.442695, %v217_v6  ;;  %v221_v10 = vmul.f32 1.442695, %v220_v7 }
  0x42   : > { %vm224_vm0 = vcmp.eq.s32.totalorder %v211_v16, 1  ;;  %vm223_vm1 = vcmp.eq.s32.totalorder %v211_v16, 0  ;;  %p490_p0 = pnand %p489_p8, %p784_p11  ;;  %s577_s12 = smov [#allocation7]  }
  0x43   : > { %448 = vpow2.f32 %v215_v8  ;;  %v231_v32 = vld [vmem:[#allocation2] sm:$0x1]  ;;  %s492_s30 = sshll.u32 %s577_s12, 4  ;;  %s493_s30 = int_to_ptr.vmem [resolvable:$false] %s492_s30 }
  0x44   : > { %450 = vpow2.f32 %v218_v9  ;;  %p491_p5 = pneg %p490_p0  ;;  %s494_s7 = scalar_lea.vmem %s493_s30, 32 }
  0x45   : > { %452 = vpow2.f32 %v221_v10  ;;  %p495_p13 = scmp.lt.s32.totalorder %s727_s19, %s493_s30  ;;  %p496_p2 = scmp.lt.s32.totalorder %s494_s7, %s488_s29 }
  0x47   : > { %p497_p4 = por %p496_p2, %p495_p13 }
  0x49   : > { %p498_p6 = pnand %p497_p4, %p491_p5 }
  0x4d   : > { %v449_v11 = vpop.eup %448 }
  0x4e   : > { %v451_v12 = vpop.eup %450 }
  0x4f   : > { %v453_v14 = vpop.eup %452  ;;  %v227_v15 = vadd.f32 %v451_v12, %v449_v11 }
  0x50   : > { %v225_v18 = vsel %vm224_vm0, %v451_v12, %v453_v14 }
  0x51   : > { %v228_v17 = vadd.f32 %v453_v14, %v227_v15  ;;  %v226_v19 = vsel %vm223_vm1, %v449_v11, %v225_v18 }
  0x53   : > { %454 = vrcp.f32 %v228_v17 }
  0x5d   : > { %v455_v20 = vpop.eup %454 }
  0x5e   : > { %v230_v21 = vmul.f32 %v455_v20, %v226_v19 }
  0x60   : > { %v233_v22 = vsel %vm232_vm2, %v230_v21, 0.0 }
  0x61   : > { %234 = vadd.xlane.f32.xlu0 %v233_v22 }
  0xee   : > { %v235_v25 = vpop.xlane.xlu0 %234 }
  0xef   : > { %v236_v26 = vrot.slane %v235_v25, 4 }
  0xf1   : > { %v237_v27 = vadd.f32 %v236_v26, %v235_v25 }
  0xf3   : > { %v238_v28 = vrot.slane %v237_v27, 2 }
  0xf5   : > { %v239_v29 = vadd.f32 %v238_v28, %v237_v27 }
  0xf7   : > { %v240_v30 = vrot.slane %v239_v29, 1 }
  0xf9   : > { %v241_v31 = vadd.f32 %v240_v30, %v239_v29 }
  0xfb   : > { %379 = vpush %v241_v31 }
 0x12c   : > { %s380_s6 = spop %379 }
 0x12d   : > { %v243_v33 = vstv %s380_s6 }
 0x12e   : > { %v244_v34 = vadd.f32 %v243_v33, %v231_v32 }
 0x130   : > { %246 = vst.msk [vmem:[#allocation2] sm:$0x1] %vm205_vm3, %v244_v34 }
 0x137   : > { %v250_v35 = vld [vmem:[#allocation2] sm:$0x1] }
 0x138   : > { %v251_v36 = vsub.f32 512.0, %v250_v35  ;;  %v252_v38 = vadd.f32 0.001, %v250_v35 }
 0x13a   : > { %v253_v37 = vadd.f32 0.001, %v251_v36 }
 0x13c   : > { %456 = vrcp.f32 %v253_v37 }
 0x146   : > { %v457_v39 = vpop.eup %456 }
 0x147   : > { %v255_v40 = vmul.f32 %v457_v39, %v252_v38 }
 0x149   : > { %258 = vperm.xlu0 %447, %v255_v40  }
 0x1c8   : > { %v259_v44 = vpop.permute.xlu0 %258 }
 0x1c9   : > { %v264_v45 = vrot.slane %v259_v44, %v263_v43 }
 0x1cb   : > { %265 = vst [vmem:[%s194_s18] sm:$0x1] %v264_v45 }
 0x1cc   : > { %501 = shalt.err (!%p498_p6)
}
 0x1cd   : > { %s502_s4 = scalar_lea.hbm %s725_s26, 16  ;;  %s506_s28 = scalar_lea.hbm %s776_s2, 32 }
 0x1ce   : > { %p503_p7 = scmp.ne.s32.totalorder %s725_s26, %s502_s4  ;;  %p507_p1 = scmp.lt.u32.totalorder %s725_s26, %s776_s2 }
 0x1cf   : > { %p508_p3 = scmp.lt.u32.totalorder %s506_s28, %s502_s4  ;;  %p510_p8 = scmp.lt.u32.totalorder %s502_s4, %s725_s26 }
 0x1d0   : > { %p504_p10 = pnand %p503_p7, %p784_p11 }
 0x1d1   : > { %p509_p9 = por %p508_p3, %p507_p1 }
 0x1d2   : > { %p505_p12 = pneg %p504_p10 }
 0x1d3   : > { %p511_p0 = por %p510_p8, %p509_p9 }
 0x1d5   : > { %p512_p5 = pnand %p511_p0, %p505_p12 }
 0x1d7   : > { %515 = shalt.err (!%p512_p5)
}
 0x1d8   : > { %383 = dma.vmem_to_hbm [thread:$0]  (%p784_p11), %s727_s19, 16, %s725_s26, %s267_s27  }
 0x1d9 PF: > { %s291_s5 = sand.u32 1, %s550_s9   ;;  %p785_p13 = scmp.ne.s32.totalorder %s781_s24, 0 }
 0x1da   : > { %p786_p2 = scmp.ge.s32.totalorder %s570_s14, 2  ;;  %s292_s6 = scalar_lea.sflag [#allocation6], %s291_s5 }
 0x1dc   : > { %p390_p4 = pnand %p786_p2, %p785_p13 }
 0x1de   : > { %545 = dma.done.wait (!%p390_p4), %s292_s6, 16  }
 0x1df   : > { %547 = vsyncadd (!%p390_p4), %s292_s6, 4294967280  ;;  %s18_s14 = sadd.s32 1, %s570_s14   ;;  %s787_s9 = smov %s554_s10 }
 0x1e0   : > { %p15_p6 = scmp.ge.s32.totalorder %s18_s14, 4   ;;  %s788_s10 = smov %s558_s11 }
 0x1e1   : > { %s789_s11 = smov %s649_s23  ;;  %s790_s12 = smov %s566_s13 }
 0x1e2   : > { %s791_s13 = smov %s793_s17  ;;  %17 = sbr.rel (!%p15_p6) target bundleno = 6 (0x6), region = 84 }
 0x1e9   :  { %296 = vsyncpa [#allocation5], 1 }
 0x1ea   :  { %298 = vsyncpa [#allocation5 + $0x1], 1 }
 0x1eb   :  { %299 = vsyncpa [#allocation6], 1 }
 0x1ec   :  { %301 = vsyncpa [#allocation6 + $0x1], 1 }

</bundles_post_ra>
